<compile_context>
chip_gen: v5e
topology: v5e:2x2
jax: 0.10.0
libtpu: 0.0.40
codegen_flags: <defaults>
</compile_context>

<pallas_src>
import jax
import jax.numpy as jnp
from jax.experimental import pallas as pl
from jax.experimental.pallas import tpu as pltpu

_LANES = 128
_TARGET_TILE_B = 2048   # per-step VMEM at this tile is only a few MiB on every gen


def _round_up(n, m):
    return ((n + m - 1) // m) * m


def _cdiv(a, b):
    return -(-a // b)


# --------------------------------------------------------------------------- #
# Parameter packing (call once per parameter set, reuse the slabs).
# --------------------------------------------------------------------------- #
def pack_realnvp_params(params, *, matmul_dtype=jnp.float32):
    """Pack the four FCNNs into one (6, 128, 128) weight slab + (8, 128) bias slab.

    params: {'t1','s1','t2','s2'} -> [w1, b1, w2, b2, w3, b3] with w* of shape
    (in, out) (pre-transposed vs nn.Linear) and b* of shape (1, out) or (out,).
    The t and s networks of each coupling are fused side by side; layer-2/3
    weights are block-diagonal so the streams never mix.  All blocks are dense
    zero-padded (128, 128) MXU tiles."""
    t1, s1, t2, s2 = params["t1"], params["s1"], params["t2"], params["s2"]
    d2, H = t1[0].shape
    dim = 2 * d2
    if 2 * H > _LANES or 2 * dim > _LANES:
        raise NotImplementedError(
            "single-block fused layout requires hidden_dim <= 64 and dim <= 64")

    W = jnp.zeros((6, _LANES, _LANES), jnp.float32)
    Bv = jnp.zeros((8, _LANES), jnp.float32)

    def bias(b):
        return jnp.reshape(jnp.asarray(b, jnp.float32), (-1,))

    def fused(W, Bv, base, t_net, s_net, in_row_off):
        tw1, tb1, tw2, tb2, tw3, tb3 = t_net
        sw1, sb1, sw2, sb2, sw3, sb3 = s_net
        # Layer 1: lane-concat [t | s]; input rows offset by in_row_off.
        W = W.at[base + 0, in_row_off:in_row_off + d2, 0:H].set(tw1)
        W = W.at[base + 0, in_row_off:in_row_off + d2, H:2 * H].set(sw1)
        Bv = Bv.at[base + 0, 0:H].set(bias(tb1)).at[base + 0, H:2 * H].set(bias(sb1))
        # Layer 2: block-diagonal.
        W = W.at[base + 1, 0:H, 0:H].set(tw2)
        W = W.at[base + 1, H:2 * H, H:2 * H].set(sw2)
        Bv = Bv.at[base + 1, 0:H].set(bias(tb2)).at[base + 1, H:2 * H].set(bias(sb2))
        # Layer 3: t-stream -> cols [0:d2], s-stream -> cols [d2:2*d2].
        W = W.at[base + 2, 0:H, 0:d2].set(tw3)
        W = W.at[base + 2, H:2 * H, d2:2 * d2].set(sw3)
        Bv = Bv.at[base + 2, 0:d2].set(bias(tb3)).at[base + 2, d2:2 * d2].set(bias(sb3))
        return W, Bv

    # Coupling A (t1/s1): layer-1 input is x itself, with the lower-half
    # selection baked in (weight rows 0:d2; rows d2.. stay zero).
    W, Bv = fused(W, Bv, 0, t1, s1, in_row_off=0)
    # Coupling B (t2/s2): layer-1 input is the assembled full-lane slab where
    # upper' occupies columns [d2:dim] -> weight rows d2:dim.
    W, Bv = fused(W, Bv, 3, t2, s2, in_row_off=d2)

    # Biases stay f32 so only the MXU operands lose precision in bf16 mode.
    return W.astype(matmul_dtype), Bv


# --------------------------------------------------------------------------- #
# Kernel
# --------------------------------------------------------------------------- #
def _make_kernel(d2, dim, xw, out_cols, matmul_dtype, low_precision_tanh):
    # bf16 tanh is only a win on v6e/v7x (bf16 EUP); keep f32 tanh on v5e.
    tanh_dtype = matmul_dtype if low_precision_tanh else jnp.float32

    def lin(h, w_ref, b_ref, i, k_rows=None):
        w = w_ref[i] if k_rows is None else w_ref[i, 0:k_rows, :]
        return (jnp.dot(h.astype(matmul_dtype), w,
                        preferred_element_type=jnp.float32)
                + b_ref[i:i + 1, :])

    def fused_mlp(h, w_ref, b_ref, base, k_rows):
        # Linear -> tanh -> Linear -> tanh -> Linear with the t and s streams
        # fused side by side in dense zero-padded (128, 128) MXU tiles.
        h = jnp.tanh(lin(h, w_ref, b_ref, base + 0, k_rows).astype(tanh_dtype))
        h = jnp.tanh(lin(h, w_ref, b_ref, base + 1).astype(tanh_dtype))
        return lin(h, w_ref, b_ref, base + 2)                  # f32

    def kernel(x_ref, w_ref, b_ref, out_ref):
        x = x_ref[...]                                         # (tile_b, xw) f32
        tb = x.shape[0]
        lower = x[:, 0:d2]
        upper = x[:, d2:dim]

        # Coupling A: fused (t1 | s1) network on the lower half.
        ts1 = fused_mlp(x, w_ref, b_ref, 0, xw)                # [t1 | s1 | 0 ...]
        t1 = ts1[:, 0:d2]
        s1 = ts1[:, d2:2 * d2]
        upper_new = t1 + upper * jnp.exp(s1)

        # Full-lane assembly [lower | upper' | s1 | 0 ...]: feeds coupling B
        # (weight block 3 selects cols d2:dim via its non-zero rows) and
        # already carries s1 for the final output.
        pieces = [lower, upper_new, s1]
        if out_cols > dim + d2:
            pieces.append(jnp.zeros((tb, out_cols - (dim + d2)), jnp.float32))
        asm = jnp.concatenate(pieces, axis=-1)                 # (tile_b, 128)

        # Coupling B: fused (t2 | s2) network on upper'.
        ts2 = fused_mlp(asm, w_ref, b_ref, 3, None)            # [t2 | s2 | 0 ...]
        t2 = ts2[:, 0:d2]
        s2 = ts2[:, d2:2 * d2]
        lower_new = t2 + lower * jnp.exp(s2)

        # Single lane-dense store: [lower' | upper' | s1 | s2 | 0 pad].
        pieces = [lower_new, upper_new, s1, s2]
        if out_cols > 2 * dim:
            pieces.append(jnp.zeros((tb, out_cols - 2 * dim), jnp.float32))
        out_ref[...] = jnp.concatenate(pieces, axis=-1)

    return kernel


# --------------------------------------------------------------------------- #
# Forward wrappers
# --------------------------------------------------------------------------- #
def realnvp_forward_packed(x, w_slab, b_slab, *, dim, low_precision_tanh=False):
    """RealNVP forward from pre-packed slabs.  Returns (z, log_diag, log_det)."""
    B = x.shape[0]
    d2 = dim // 2
    xw = _round_up(dim, 8)
    out_cols = _LANES
    matmul_dtype = w_slab.dtype

    # Batch tiling: large tiles amortize the ~0.35us/step grid overhead; the
    # batch is padded so every step is a full tile; prefer >= 2 grid steps so
    # v7x's two TensorCores both get work on the "parallel" batch axis.
    b8 = _round_up(max(B, 8), 8)
    tile_b = min(b8, _TARGET_TILE_B)
    num = _cdiv(b8, tile_b)
    if num == 1 and b8 >= 16:
        tile_b = _round_up(_cdiv(b8, 2), 8)
        num = _cdiv(b8, tile_b)
    b_pad = num * tile_b

    xp = x.astype(jnp.float32)
    if b_pad != B or xw != x.shape[1]:
        xp = jnp.zeros((b_pad, xw), jnp.float32).at[:B, :x.shape[1]].set(xp)

    kernel = _make_kernel(d2, dim, xw, out_cols, matmul_dtype, low_precision_tanh)

    out = pl.pallas_call(
        kernel,
        out_shape=jax.ShapeDtypeStruct((b_pad, out_cols), jnp.float32),
        grid_spec=pltpu.PrefetchScalarGridSpec(
            num_scalar_prefetch=0,
            grid=(num,),
            in_specs=[
                pl.BlockSpec((tile_b, xw), lambda i: (i, 0)),
                # Weight/bias slabs are VMEM-resident across the whole grid
                # (constant block index -> no re-DMA between steps).
                pl.BlockSpec(w_slab.shape, lambda i: (0, 0, 0)),
                pl.BlockSpec(b_slab.shape, lambda i: (0, 0)),
            ],
            out_specs=pl.BlockSpec((tile_b, out_cols), lambda i: (i, 0)),
        ),
        compiler_params=pltpu.CompilerParams(
            dimension_semantics=("parallel",),
            vmem_limit_bytes=32 * 1024 * 1024),
    )(xp, w_slab, b_slab)

    z = out[:B, 0:dim]
    s1 = out[:B, dim:dim + d2]
    s2 = out[:B, dim + d2:2 * dim]
    log_diag = jnp.concatenate([s1, s2], axis=0)        # (2B, d2), s1 rows first
    log_det = jnp.sum(out[:B, dim:2 * dim], axis=1)     # sum(s1) + sum(s2)
    return z, log_diag, log_det


def realnvp_forward(x, params, *, matmul_dtype=jnp.float32, low_precision_tanh=False):
    """Convenience wrapper (packs params; prefer packing once and reusing)."""
    w_slab, b_slab = pack_realnvp_params(params, matmul_dtype=matmul_dtype)
    dim = 2 * params["t1"][0].shape[0]
    return realnvp_forward_packed(x, w_slab, b_slab, dim=dim,
                                  low_precision_tanh=low_precision_tanh)


# --------------------------------------------------------------------------- #
# Reference + init
# --------------------------------------------------------------------------- #
def init_fcnn_params(key, in_dim, out_dim, hidden_dim):
    """Deterministic synthetic init (nn.Linear shapes, weights pre-transposed)."""
    k = jax.random.split(key, 6)
    scale1 = 1.0 / jnp.sqrt(in_dim)
    scale2 = 1.0 / jnp.sqrt(hidden_dim)
    w1 = jax.random.uniform(k[0], (in_dim, hidden_dim), jnp.float32, -scale1, scale1)
    b1 = jax.random.uniform(k[1], (1, hidden_dim), jnp.float32, -scale1, scale1)
    w2 = jax.random.uniform(k[2], (hidden_dim, hidden_dim), jnp.float32, -scale2, scale2)
    b2 = jax.random.uniform(k[3], (1, hidden_dim), jnp.float32, -scale2, scale2)
    w3 = jax.random.uniform(k[4], (hidden_dim, out_dim), jnp.float32, -scale2, scale2)
    b3 = jax.random.uniform(k[5], (1, out_dim), jnp.float32, -scale2, scale2)
    return [w1, b1, w2, b2, w3, b3]


def realnvp_reference(x, params):
    """Pure-JAX reference mirroring the PyTorch forward exactly (f32 matmuls)."""
    hp = jax.lax.Precision.HIGHEST

    def fcnn(h, p):
        w1, b1, w2, b2, w3, b3 = p
        h = jnp.tanh(jnp.dot(h, w1, precision=hp) + b1)
        h = jnp.tanh(jnp.dot(h, w2, precision=hp) + b2)
        return jnp.dot(h, w3, precision=hp) + b3

    dim = x.shape[1]
    d2 = dim // 2
    lower, upper = x[:, :d2], x[:, d2:]
    t1 = fcnn(lower, params["t1"])
    s1 = fcnn(lower, params["s1"])
    upper = t1 + upper * jnp.exp(s1)
    t2 = fcnn(upper, params["t2"])
    s2 = fcnn(upper, params["s2"])
    lower = t2 + lower * jnp.exp(s2)
    z = jnp.concatenate([lower, upper], axis=1)
    log_diag = jnp.concatenate([s1, s2], axis=0)
    log_det = jnp.sum(s1, axis=1) + jnp.sum(s2, axis=1)
    return z, log_diag, log_det


if __name__ == "__main__":
    # Small shapes consistent with the module: batch=8, dim=8 (dim//2 = 4),
    # hidden_dim=32.
    B, dim, hidden_dim = 8, 8, 32
    d2 = dim // 2

    key = jax.random.PRNGKey(0)
    kx, kt1, ks1, kt2, ks2 = jax.random.split(key, 5)

    x = jax.random.normal(kx, (B, dim), dtype=jnp.float32)
    params = {
        "t1": init_fcnn_params(kt1, d2, d2, hidden_dim),
        "s1": init_fcnn_params(ks1, d2, d2, hidden_dim),
        "t2": init_fcnn_params(kt2, d2, d2, hidden_dim),
        "s2": init_fcnn_params(ks2, d2, d2, hidden_dim),
    }

    z_ref, ld_ref, det_ref = realnvp_reference(x, params)

    # f32 path (exact): pack once, reuse slabs (packing hoisted off the step path).
    w_slab, b_slab = pack_realnvp_params(params, matmul_dtype=jnp.float32)
    z, log_diag, log_det = realnvp_forward_packed(x, w_slab, b_slab, dim=dim)
    jax.block_until_ready((z, log_diag, log_det))
    assert z.shape == (B, dim)
    assert log_diag.shape == (2 * B, d2)
    assert log_det.shape == (B,)
    assert jnp.allclose(z, z_ref, atol=1e-5, rtol=1e-5)
    assert jnp.allclose(log_diag, ld_ref, atol=1e-5, rtol=1e-5)
    assert jnp.allclose(log_det, det_ref, atol=1e-5, rtol=1e-5)

    # bf16 MXU-operand path (v5e/v6e/v7x optimization): relaxed tolerance; the
    # elementwise exp/affine math stays f32.  (On v6e/v7x also consider
    # low_precision_tanh=True for bf16 tanh on the bf16-capable EUP.)
    w_bf, b_bf = pack_realnvp_params(params, matmul_dtype=jnp.bfloat16)
    z_bf, ld_bf, det_bf = realnvp_forward_packed(x, w_bf, b_bf, dim=dim)
    jax.block_until_ready((z_bf, ld_bf, det_bf))
    assert jnp.allclose(z_bf, z_ref, atol=1e-1, rtol=1e-1)
    assert jnp.allclose(ld_bf, ld_ref, atol=1e-1, rtol=1e-1)
    assert jnp.allclose(det_bf, det_ref, atol=1e-1, rtol=1e-1)

    print("KERNEL_OK")
</pallas_src>

<mosaic_0001>
module attributes {stable_mosaic.version = 11 : i64} {
  func.func @kernel(%arg0: i32, %arg1: memref<8x8xf32, #tpu.memory_space<vmem>>, %arg2: memref<6x128x128xf32, #tpu.memory_space<vmem>>, %arg3: memref<8x128xf32, #tpu.memory_space<vmem>>, %arg4: memref<8x128xf32, #tpu.memory_space<vmem>>) attributes {dimension_semantics = [#tpu.dimension_semantics<parallel>], iteration_bounds = array<i64: 1>, scalar_prefetch = 0 : i64, scratch_operands = 0 : i64, tpu.core_type = #tpu.core_type<tc>, window_params = [{transform_indices = @transform_0, window_bounds = array<i64: 8, 8>}, {pipeline_mode = #tpu.pipeline_mode<synchronous>, transform_indices = @transform_1, window_bounds = array<i64: 6, 128, 128>}, {pipeline_mode = #tpu.pipeline_mode<synchronous>, transform_indices = @transform_2, window_bounds = array<i64: 8, 128>}, {transform_indices = @transform_3, window_bounds = array<i64: 8, 128>}]} {
    %c0 = arith.constant 0 : index
    %c0_0 = arith.constant 0 : index
    %0 = vector.load %arg1[%c0, %c0_0] : memref<8x8xf32, #tpu.memory_space<vmem>>, vector<8x8xf32>
    %1 = vector.extract_strided_slice %0 {offsets = [0, 0], sizes = [8, 4], strides = [1, 1]} : vector<8x8xf32> to vector<8x4xf32>
    %2 = vector.extract_strided_slice %0 {offsets = [0, 4], sizes = [8, 4], strides = [1, 1]} : vector<8x8xf32> to vector<8x4xf32>
    %c0_1 = arith.constant 0 : index
    %c0_2 = arith.constant 0 : index
    %c0_3 = arith.constant 0 : index
    %3 = vector.load %arg2[%c0_1, %c0_2, %c0_3] : memref<6x128x128xf32, #tpu.memory_space<vmem>>, vector<1x8x128xf32>
    %4 = vector.shape_cast %3 : vector<1x8x128xf32> to vector<8x128xf32>
    %cst = arith.constant dense<0.000000e+00> : vector<8x128xf32>
    %5 = tpu.matmul %0, %4, %cst {dimension_numbers = #tpu.dot_dimension_numbers<[1], [0], [0], [1], [0, 0, 1, 1], [], []>} : vector<8x8xf32>, vector<8x128xf32>, vector<8x128xf32> -> vector<8x128xf32>
    %c0_4 = arith.constant 0 : index
    %c0_5 = arith.constant 0 : index
    %6 = vector.load %arg3[%c0_4, %c0_5] : memref<8x128xf32, #tpu.memory_space<vmem>>, vector<1x128xf32>
    %7 = vector.broadcast %6 : vector<1x128xf32> to vector<8x128xf32>
    %8 = arith.addf %5, %7 : vector<8x128xf32>
    %9 = math.tanh %8 : vector<8x128xf32>
    %c1 = arith.constant 1 : index
    %c0_6 = arith.constant 0 : index
    %c0_7 = arith.constant 0 : index
    %10 = vector.load %arg2[%c1, %c0_6, %c0_7] : memref<6x128x128xf32, #tpu.memory_space<vmem>>, vector<1x128x128xf32>
    %11 = vector.shape_cast %10 : vector<1x128x128xf32> to vector<128x128xf32>
    %cst_8 = arith.constant dense<0.000000e+00> : vector<8x128xf32>
    %12 = tpu.matmul %9, %11, %cst_8 {dimension_numbers = #tpu.dot_dimension_numbers<[1], [0], [0], [1], [0, 0, 1, 1], [], []>} : vector<8x128xf32>, vector<128x128xf32>, vector<8x128xf32> -> vector<8x128xf32>
    %c1_9 = arith.constant 1 : index
    %c0_10 = arith.constant 0 : index
    %13 = vector.load %arg3[%c1_9, %c0_10] : memref<8x128xf32, #tpu.memory_space<vmem>>, vector<1x128xf32>
    %14 = vector.broadcast %13 : vector<1x128xf32> to vector<8x128xf32>
    %15 = arith.addf %12, %14 : vector<8x128xf32>
    %16 = math.tanh %15 : vector<8x128xf32>
    %c2 = arith.constant 2 : index
    %c0_11 = arith.constant 0 : index
    %c0_12 = arith.constant 0 : index
    %17 = vector.load %arg2[%c2, %c0_11, %c0_12] : memref<6x128x128xf32, #tpu.memory_space<vmem>>, vector<1x128x128xf32>
    %18 = vector.shape_cast %17 : vector<1x128x128xf32> to vector<128x128xf32>
    %cst_13 = arith.constant dense<0.000000e+00> : vector<8x128xf32>
    %19 = tpu.matmul %16, %18, %cst_13 {dimension_numbers = #tpu.dot_dimension_numbers<[1], [0], [0], [1], [0, 0, 1, 1], [], []>} : vector<8x128xf32>, vector<128x128xf32>, vector<8x128xf32> -> vector<8x128xf32>
    %c2_14 = arith.constant 2 : index
    %c0_15 = arith.constant 0 : index
    %20 = vector.load %arg3[%c2_14, %c0_15] : memref<8x128xf32, #tpu.memory_space<vmem>>, vector<1x128xf32>
    %21 = vector.broadcast %20 : vector<1x128xf32> to vector<8x128xf32>
    %22 = arith.addf %19, %21 : vector<8x128xf32>
    %23 = vector.extract_strided_slice %22 {offsets = [0, 0], sizes = [8, 4], strides = [1, 1]} : vector<8x128xf32> to vector<8x4xf32>
    %24 = vector.extract_strided_slice %22 {offsets = [0, 4], sizes = [8, 4], strides = [1, 1]} : vector<8x128xf32> to vector<8x4xf32>
    %25 = math.exp %24 : vector<8x4xf32>
    %26 = arith.mulf %2, %25 : vector<8x4xf32>
    %27 = arith.addf %23, %26 : vector<8x4xf32>
    %cst_16 = arith.constant 0.000000e+00 : f32
    %28 = vector.broadcast %cst_16 : f32 to vector<8x116xf32>
    %29 = tpu.concatenate %1, %27, %24, %28 in 1 : vector<8x4xf32>, vector<8x4xf32>, vector<8x4xf32>, vector<8x116xf32> -> vector<8x128xf32>
    %c3 = arith.constant 3 : index
    %c0_17 = arith.constant 0 : index
    %c0_18 = arith.constant 0 : index
    %30 = vector.load %arg2[%c3, %c0_17, %c0_18] : memref<6x128x128xf32, #tpu.memory_space<vmem>>, vector<1x128x128xf32>
    %31 = vector.shape_cast %30 : vector<1x128x128xf32> to vector<128x128xf32>
    %cst_19 = arith.constant dense<0.000000e+00> : vector<8x128xf32>
    %32 = tpu.matmul %29, %31, %cst_19 {dimension_numbers = #tpu.dot_dimension_numbers<[1], [0], [0], [1], [0, 0, 1, 1], [], []>} : vector<8x128xf32>, vector<128x128xf32>, vector<8x128xf32> -> vector<8x128xf32>
    %c3_20 = arith.constant 3 : index
    %c0_21 = arith.constant 0 : index
    %33 = vector.load %arg3[%c3_20, %c0_21] : memref<8x128xf32, #tpu.memory_space<vmem>>, vector<1x128xf32>
    %34 = vector.broadcast %33 : vector<1x128xf32> to vector<8x128xf32>
    %35 = arith.addf %32, %34 : vector<8x128xf32>
    %36 = math.tanh %35 : vector<8x128xf32>
    %c4 = arith.constant 4 : index
    %c0_22 = arith.constant 0 : index
    %c0_23 = arith.constant 0 : index
    %37 = vector.load %arg2[%c4, %c0_22, %c0_23] : memref<6x128x128xf32, #tpu.memory_space<vmem>>, vector<1x128x128xf32>
    %38 = vector.shape_cast %37 : vector<1x128x128xf32> to vector<128x128xf32>
    %cst_24 = arith.constant dense<0.000000e+00> : vector<8x128xf32>
    %39 = tpu.matmul %36, %38, %cst_24 {dimension_numbers = #tpu.dot_dimension_numbers<[1], [0], [0], [1], [0, 0, 1, 1], [], []>} : vector<8x128xf32>, vector<128x128xf32>, vector<8x128xf32> -> vector<8x128xf32>
    %c4_25 = arith.constant 4 : index
    %c0_26 = arith.constant 0 : index
    %40 = vector.load %arg3[%c4_25, %c0_26] : memref<8x128xf32, #tpu.memory_space<vmem>>, vector<1x128xf32>
    %41 = vector.broadcast %40 : vector<1x128xf32> to vector<8x128xf32>
    %42 = arith.addf %39, %41 : vector<8x128xf32>
    %43 = math.tanh %42 : vector<8x128xf32>
    %c5 = arith.constant 5 : index
    %c0_27 = arith.constant 0 : index
    %c0_28 = arith.constant 0 : index
    %44 = vector.load %arg2[%c5, %c0_27, %c0_28] : memref<6x128x128xf32, #tpu.memory_space<vmem>>, vector<1x128x128xf32>
    %45 = vector.shape_cast %44 : vector<1x128x128xf32> to vector<128x128xf32>
    %cst_29 = arith.constant dense<0.000000e+00> : vector<8x128xf32>
    %46 = tpu.matmul %43, %45, %cst_29 {dimension_numbers = #tpu.dot_dimension_numbers<[1], [0], [0], [1], [0, 0, 1, 1], [], []>} : vector<8x128xf32>, vector<128x128xf32>, vector<8x128xf32> -> vector<8x128xf32>
    %c5_30 = arith.constant 5 : index
    %c0_31 = arith.constant 0 : index
    %47 = vector.load %arg3[%c5_30, %c0_31] : memref<8x128xf32, #tpu.memory_space<vmem>>, vector<1x128xf32>
    %48 = vector.broadcast %47 : vector<1x128xf32> to vector<8x128xf32>
    %49 = arith.addf %46, %48 : vector<8x128xf32>
    %50 = vector.extract_strided_slice %49 {offsets = [0, 0], sizes = [8, 4], strides = [1, 1]} : vector<8x128xf32> to vector<8x4xf32>
    %51 = vector.extract_strided_slice %49 {offsets = [0, 4], sizes = [8, 4], strides = [1, 1]} : vector<8x128xf32> to vector<8x4xf32>
    %52 = math.exp %51 : vector<8x4xf32>
    %53 = arith.mulf %1, %52 : vector<8x4xf32>
    %54 = arith.addf %50, %53 : vector<8x4xf32>
    %cst_32 = arith.constant 0.000000e+00 : f32
    %55 = vector.broadcast %cst_32 : f32 to vector<8x112xf32>
    %56 = tpu.concatenate %54, %27, %24, %51, %55 in 1 : vector<8x4xf32>, vector<8x4xf32>, vector<8x4xf32>, vector<8x4xf32>, vector<8x112xf32> -> vector<8x128xf32>
    %c0_33 = arith.constant 0 : index
    %c0_34 = arith.constant 0 : index
    %57 = vector.load %arg4[%c0_33, %c0_34] : memref<8x128xf32, #tpu.memory_space<vmem>>, vector<8x128xf32>
    tpu.vector_store %arg4[%c0_33, %c0_34], %56 {strides = array<i32>} : memref<8x128xf32, #tpu.memory_space<vmem>>, vector<8x128xf32>,
    return
  }
  func.func @transform_0(%arg0: i32) -> (i32, i32) {
    %c0_i32 = arith.constant 0 : i32
    %c0_i32_0 = arith.constant 0 : i32
    return %arg0, %c0_i32 : i32, i32
  }
  func.func @transform_1(%arg0: i32) -> (i32, i32, i32) {
    %c0_i32 = arith.constant 0 : i32
    %c0_i32_0 = arith.constant 0 : i32
    %c0_i32_1 = arith.constant 0 : i32
    %c0_i32_2 = arith.constant 0 : i32
    return %c0_i32, %c0_i32_0, %c0_i32_1 : i32, i32, i32
  }
  func.func @transform_2(%arg0: i32) -> (i32, i32) {
    %c0_i32 = arith.constant 0 : i32
    %c0_i32_0 = arith.constant 0 : i32
    %c0_i32_1 = arith.constant 0 : i32
    return %c0_i32, %c0_i32_0 : i32, i32
  }
  func.func @transform_3(%arg0: i32) -> (i32, i32) {
    %c0_i32 = arith.constant 0 : i32
    %c0_i32_0 = arith.constant 0 : i32
    return %arg0, %c0_i32 : i32, i32
  }
}

</mosaic_0001>

<bundles_post_ra>
// kernel: tpu_custom_call.1
= control target key start
LH: loop header
LB: loop body
LE: loop exit
PB: predicated region body
PF: predicated region fallthrough
CT: control target
= control target key end

     0   :  { %8 = vsyncpa [#allocation3], 0  ;;  %s539_s0 = inlined_call_operand.hbm [shape: f32[8,8], index: 0, kind: input, shape index: {}]   ;;  %s540_s1 = inlined_call_operand.hbm [shape: f32[6,128,128], index: 1, kind: input, shape index: {}]   ;;  %s541_s2 = inlined_call_operand.hbm [shape: f32[8,128], index: 2, kind: input, shape index: {}]   ;;  %s542_s3 = inlined_call_operand.hbm [shape: f32[8,128], index: 3, kind: output, shape index: {}]  }
   0x1   :  { %9 = vsyncpa [#allocation6], 0  ;;  %s26_s14 = sshll.u32 %s540_s1, 4  ;;  %s27_s14 = int_to_ptr.hbm [resolvable:$true] %s26_s14 }
   0x2   :  { %10 = vsyncpa [#allocation4], 0  ;;  %s472_s15 = smov [#allocation5]   ;;  %s16_s19 = sshll.u32 %s539_s0, 4  ;;  %s17_s19 = int_to_ptr.hbm [resolvable:$true] %s16_s19 }
   0x3   :  { %s28_s16 = sshll.u32 %s472_s15, 4  ;;  %s473_s20 = smov 128   ;;  %s29_s16 = int_to_ptr.vmem [resolvable:$true] %s28_s16 }
   0x4   :  { %s474_s21 = smov 8   ;;  %s475_s22 = smov [#allocation2]  }
   0x5   :  { %34 = dma.hbm_to_vmem [thread:$0]  %s27_s14, 12288, %s29_s16, [#allocation6], %s473_s20, %s473_s20, %s474_s21  }
   0x6   :  { %s18_s23 = sshll.u32 %s475_s22, 4  ;;  %s40_s1 = sshll.u32 %s541_s2, 4  ;;  %s19_s23 = int_to_ptr.vmem [resolvable:$true] %s18_s23  ;;  %s41_s1 = int_to_ptr.hbm [resolvable:$true] %s40_s1 }
   0x7   :  { %21 = dma.hbm_to_vmem [thread:$0]  %s17_s19, 128, %s19_s23, [#allocation3]  }
   0x8   :  { %s476_s26 = smov [#allocation7]  }
   0x9   :  { %s42_s27 = sshll.u32 %s476_s26, 4  ;;  %s43_s27 = int_to_ptr.vmem [resolvable:$true] %s42_s27 }
   0xa   :  { %45 = dma.hbm_to_vmem [thread:$0]  %s41_s1, 128, %s43_s27, [#allocation6]  }
   0xb   :  { %466 = dma.done.wait [#allocation3], 128  }
   0xc   :  { %467 = vsyncadd [#allocation3], 4294967168 }
   0xd   :  { %468 = dma.done.wait [#allocation6], 12416  }
   0xe   :  { %469 = vsyncadd [#allocation6], 4294954880  ;;  %vm62_vm0 = vcmask 64512   ;;  %v59_v0 = vld [vmem:[#allocation5] sm:$0xff]  ;;  %v510_v1 = vld [vmem:[#allocation2] sm:$0xff]  ;;  %s477_s0 = smov 4  }
   0xf   :  { %v103_v2 = vld [vmem:[#allocation5 + $0xf8] sm:$0xff]  ;;  %81 = vmatpush.msra.mxu0 %v59_v0  ;;  %v102_v3 = vld [vmem:[#allocation5 + $0xf0] sm:$0xff]  ;;  %v101_v4 = vld [vmem:[#allocation5 + $0xe8] sm:$0xff]  ;;  %s478_s2 = smov 124   ;;  %vm182_vm1 = vcmask 31744   ;;  %vm185_vm2 = vcmask 97280  }
  0x10   :  { %106 = vmatpush.msra.mxu1 %v103_v2  ;;  %342 = vmatmul.msk.f32.vlgmr.msra.gmra.mxu0 %vm62_vm0, %v510_v1  ;;  %v100_v5 = vld [vmem:[#allocation5 + $0xe0] sm:$0xff]  ;;  %v99_v6 = vld [vmem:[#allocation5 + $0xd8] sm:$0xff]  ;;  %v98_v7 = vld [vmem:[#allocation5 + $0xd0] sm:$0xff]  ;;  %s479_s28 = smov [#allocation8]   ;;  %s331_s5 = sshll.u32 %s542_s3, 4  ;;  %vm321_vm3 = vcmask 130048   ;;  %s332_s5 = int_to_ptr.hbm [resolvable:$true] %s331_s5 }
  0x11   :  { %v97_v8 = vld [vmem:[#allocation5 + $0xc8] sm:$0xff]  ;;  %v96_v9 = vld [vmem:[#allocation5 + $0xc0] sm:$0xff]  ;;  %v95_v10 = vld [vmem:[#allocation5 + $0xb8] sm:$0xff]  ;;  %s329_s29 = sshll.u32 %s479_s28, 4  ;;  %s330_s29 = int_to_ptr.vmem [resolvable:$true] %s329_s29 }
  0x12   :  { %107 = vmatpush.msra.mxu1 %v102_v3  ;;  %v94_v11 = vld [vmem:[#allocation5 + $0xb0] sm:$0xff]  ;;  %v93_v12 = vld [vmem:[#allocation5 + $0xa8] sm:$0xff]  ;;  %v92_v13 = vld [vmem:[#allocation5 + $0xa0] sm:$0xff] }
  0x13   :  { %v91_v14 = vld [vmem:[#allocation5 + $0x98] sm:$0xff]  ;;  %v90_v15 = vld [vmem:[#allocation5 + $0x90] sm:$0xff]  ;;  %v89_v16 = vld [vmem:[#allocation5 + $0x88] sm:$0xff] }
  0x14   :  { %108 = vmatpush.msra.mxu1 %v101_v4  ;;  %v88_v17 = vld [vmem:[#allocation5 + $0x80] sm:$0xff]  ;;  %v143_v18 = vld [vmem:[#allocation5 + $0x178] sm:$0xff]  ;;  %v142_v19 = vld [vmem:[#allocation5 + $0x170] sm:$0xff] }
  0x15   :  { %146 = vmatpush.msra.mxu2 %v143_v18  ;;  %v141_v20 = vld [vmem:[#allocation5 + $0x168] sm:$0xff]  ;;  %v140_v21 = vld [vmem:[#allocation5 + $0x160] sm:$0xff]  ;;  %v139_v22 = vld [vmem:[#allocation5 + $0x158] sm:$0xff] }
  0x16   :  { %109 = vmatpush.msra.mxu1 %v100_v5  ;;  %v138_v23 = vld [vmem:[#allocation5 + $0x150] sm:$0xff]  ;;  %v137_v24 = vld [vmem:[#allocation5 + $0x148] sm:$0xff]  ;;  %v136_v25 = vld [vmem:[#allocation5 + $0x140] sm:$0xff] }
  0x17   :  { %147 = vmatpush.msra.mxu2 %v142_v19  ;;  %v135_v26 = vld [vmem:[#allocation5 + $0x138] sm:$0xff]  ;;  %v134_v27 = vld [vmem:[#allocation5 + $0x130] sm:$0xff]  ;;  %v133_v28 = vld [vmem:[#allocation5 + $0x128] sm:$0xff] }
  0x18   :  { %110 = vmatpush.msra.mxu1 %v99_v6  ;;  %v352_v29 = vld [vmem:[#allocation7] ss:$0 sm:$0xff]  ;;  %v131_v34 = vld [vmem:[#allocation5 + $0x118] sm:$0xff]  ;;  %v130_v35 = vld [vmem:[#allocation5 + $0x110] sm:$0xff] }
  0x19   :  { %148 = vmatpush.msra.mxu2 %v141_v20  ;;  %v132_v33 = vld [vmem:[#allocation5 + $0x120] sm:$0xff]  ;;  %v129_v36 = vld [vmem:[#allocation5 + $0x108] sm:$0xff]  ;;  %v203_v48 = vld [vmem:[#allocation5 + $0x1f8] sm:$0xff] }
  0x1a   :  { %111 = vmatpush.msra.mxu1 %v98_v7  ;;  %v128_v37 = vld [vmem:[#allocation5 + $0x100] sm:$0xff]  ;;  %v202_v49 = vld [vmem:[#allocation5 + $0x1f0] sm:$0xff]  ;;  %206 = vmatpush.msra.mxu3 %v203_v48  ;;  %v201_v50 = vld [vmem:[#allocation5 + $0x1e8] sm:$0xff] }
  0x1b   :  { %149 = vmatpush.msra.mxu2 %v140_v21  ;;  %v353_v38 = vld [vmem:[#allocation7 + $0x1] ss:$0 sm:$0xff]  ;;  %v354_v42 = vld [vmem:[#allocation7 + $0x2] ss:$0 sm:$0xff]  ;;  %v199_v52 = vld [vmem:[#allocation5 + $0x1d8] sm:$0xff] }
  0x1c   :  { %112 = vmatpush.msra.mxu1 %v97_v8  ;;  %207 = vmatpush.msra.mxu3 %v202_v49  ;;  %v200_v51 = vld [vmem:[#allocation5 + $0x1e0] sm:$0xff]  ;;  %v198_v53 = vld [vmem:[#allocation5 + $0x1d0] sm:$0xff]  ;;  %v197_v54 = vld [vmem:[#allocation5 + $0x1c8] sm:$0xff] }
  0x1d   :  { %150 = vmatpush.msra.mxu2 %v139_v22  ;;  %v196_v55 = vld [vmem:[#allocation5 + $0x1c0] sm:$0xff]  ;;  %v195_v56 = vld [vmem:[#allocation5 + $0x1b8] sm:$0xff]  ;;  %v194_v57 = vld [vmem:[#allocation5 + $0x1b0] sm:$0xff] }
  0x1e   :  { %113 = vmatpush.msra.mxu1 %v96_v9  ;;  %208 = vmatpush.msra.mxu3 %v201_v50  ;;  %v193_v58 = vld [vmem:[#allocation5 + $0x1a8] sm:$0xff]  ;;  %v192_v59 = vld [vmem:[#allocation5 + $0x1a0] sm:$0xff]  ;;  %v191_v60 = vld [vmem:[#allocation5 + $0x198] sm:$0xff] }
  0x1f   :  { %151 = vmatpush.msra.mxu2 %v138_v23  ;;  %v190_v61 = vld [vmem:[#allocation5 + $0x190] sm:$0xff]  ;;  %v189_v62 = vld [vmem:[#allocation5 + $0x188] sm:$0xff]  ;;  %v188_v2 = vld [vmem:[#allocation5 + $0x180] sm:$0xff] }
  0x20   :  { %114 = vmatpush.msra.mxu1 %v95_v10  ;;  %209 = vmatpush.msra.mxu3 %v200_v51  ;;  %v243_v3 = vld [vmem:[#allocation5 + $0x278] sm:$0xff]  ;;  %v242_v4 = vld [vmem:[#allocation5 + $0x270] sm:$0xff]  ;;  %v241_v5 = vld [vmem:[#allocation5 + $0x268] sm:$0xff] }
  0x21   :  { %152 = vmatpush.msra.mxu2 %v137_v24  ;;  %246 = vmatpush.msrb.mxu0 %v243_v3  ;;  %v240_v6 = vld [vmem:[#allocation5 + $0x260] sm:$0xff]  ;;  %v239_v7 = vld [vmem:[#allocation5 + $0x258] sm:$0xff]  ;;  %v238_v8 = vld [vmem:[#allocation5 + $0x250] sm:$0xff] }
  0x22   :  { %115 = vmatpush.msra.mxu1 %v94_v11  ;;  %210 = vmatpush.msra.mxu3 %v199_v52  ;;  %v237_v9 = vld [vmem:[#allocation5 + $0x248] sm:$0xff]  ;;  %v236_v10 = vld [vmem:[#allocation5 + $0x240] sm:$0xff]  ;;  %v235_v11 = vld [vmem:[#allocation5 + $0x238] sm:$0xff] }
  0x23   :  { %153 = vmatpush.msra.mxu2 %v136_v25  ;;  %247 = vmatpush.msrb.mxu0 %v242_v4  ;;  %v232_v18 = vld [vmem:[#allocation5 + $0x220] sm:$0xff]  ;;  %v231_v19 = vld [vmem:[#allocation5 + $0x218] sm:$0xff]  ;;  %v230_v20 = vld [vmem:[#allocation5 + $0x210] sm:$0xff] }
  0x24   :  { %116 = vmatpush.msra.mxu1 %v93_v12  ;;  %211 = vmatpush.msra.mxu3 %v198_v53  ;;  %v234_v12 = vld [vmem:[#allocation5 + $0x230] sm:$0xff]  ;;  %v229_v21 = vld [vmem:[#allocation5 + $0x208] sm:$0xff]  ;;  %v228_v22 = vld [vmem:[#allocation5 + $0x200] sm:$0xff] }
  0x25   :  { %154 = vmatpush.msra.mxu2 %v135_v26  ;;  %248 = vmatpush.msrb.mxu0 %v241_v5  ;;  %v283_v23 = vld [vmem:[#allocation5 + $0x2f8] sm:$0xff]  ;;  %v282_v24 = vld [vmem:[#allocation5 + $0x2f0] sm:$0xff]  ;;  %v281_v25 = vld [vmem:[#allocation5 + $0x2e8] sm:$0xff] }
  0x26   :  { %117 = vmatpush.msra.mxu1 %v92_v13  ;;  %212 = vmatpush.msra.mxu3 %v197_v54  ;;  %v233_v13 = vld [vmem:[#allocation5 + $0x228] sm:$0xff]  ;;  %v280_v26 = vld [vmem:[#allocation5 + $0x2e0] sm:$0xff] }
  0x27   :  { %155 = vmatpush.msra.mxu2 %v134_v27  ;;  %249 = vmatpush.msrb.mxu0 %v240_v6  ;;  %v279_v27 = vld [vmem:[#allocation5 + $0x2d8] sm:$0xff] }
  0x28   :  { %118 = vmatpush.msra.mxu1 %v91_v14  ;;  %213 = vmatpush.msra.mxu3 %v196_v55 }
  0x29   :  { %156 = vmatpush.msra.mxu2 %v133_v28  ;;  %250 = vmatpush.msrb.mxu0 %v239_v7  ;;  %v278_v28 = vld [vmem:[#allocation5 + $0x2d0] sm:$0xff] }
  0x2a   :  { %119 = vmatpush.msra.mxu1 %v90_v15  ;;  %214 = vmatpush.msra.mxu3 %v195_v56 }
  0x2b   :  { %157 = vmatpush.msra.mxu2 %v132_v33  ;;  %251 = vmatpush.msrb.mxu0 %v238_v8  ;;  %v273_v33 = vld [vmem:[#allocation5 + $0x2a8] sm:$0xff] }
  0x2c   :  { %120 = vmatpush.msra.mxu1 %v89_v16  ;;  %215 = vmatpush.msra.mxu3 %v194_v57 }
  0x2d   :  { %158 = vmatpush.msra.mxu2 %v131_v34  ;;  %252 = vmatpush.msrb.mxu0 %v237_v9  ;;  %v355_v34 = vld [vmem:[#allocation7 + $0x3] ss:$0 sm:$0xff] }
  0x2e   :  { %121 = vmatpush.msra.mxu1 %v88_v17  ;;  %216 = vmatpush.msra.mxu3 %v193_v58 }
  0x2f   :  { %159 = vmatpush.msra.mxu2 %v130_v35  ;;  %253 = vmatpush.msrb.mxu0 %v236_v10 }
  0x30   :  { %217 = vmatpush.msra.mxu3 %v192_v59  ;;  %286 = vmatpush.msrb.mxu1 %v283_v23 }
  0x31   :  { %160 = vmatpush.msra.mxu2 %v129_v36  ;;  %254 = vmatpush.msrb.mxu0 %v235_v11 }
  0x32   :  { %218 = vmatpush.msra.mxu3 %v191_v60  ;;  %287 = vmatpush.msrb.mxu1 %v282_v24 }
  0x33   :  { %161 = vmatpush.msra.mxu2 %v128_v37  ;;  %255 = vmatpush.msrb.mxu0 %v234_v12 }
  0x34   :  { %219 = vmatpush.msra.mxu3 %v190_v61  ;;  %288 = vmatpush.msrb.mxu1 %v281_v25 }
  0x35   :  { %256 = vmatpush.msrb.mxu0 %v233_v13 }
  0x36   :  { %220 = vmatpush.msra.mxu3 %v189_v62  ;;  %289 = vmatpush.msrb.mxu1 %v280_v26 }
  0x37   :  { %257 = vmatpush.msrb.mxu0 %v232_v18 }
  0x38   :  { %221 = vmatpush.msra.mxu3 %v188_v2  ;;  %290 = vmatpush.msrb.mxu1 %v279_v27 }
  0x39   :  { %258 = vmatpush.msrb.mxu0 %v231_v19 }
  0x3a   :  { %291 = vmatpush.msrb.mxu1 %v278_v28 }
  0x3b   :  { %259 = vmatpush.msrb.mxu0 %v230_v20 }
  0x3d   :  { %260 = vmatpush.msrb.mxu0 %v229_v21 }
  0x3f   :  { %261 = vmatpush.msrb.mxu0 %v228_v22 }
  0x8d   :  { %v83_v30 = vpop.f32.mrf.mxu0 }
  0x8e   :  { %v84_v31 = vadd.f32 %v352_v29, %v83_v30  ;;  %v277_v29 = vld [vmem:[#allocation5 + $0x2c8] sm:$0xff]  ;;  %v276_v30 = vld [vmem:[#allocation5 + $0x2c0] sm:$0xff] }
  0x8f   :  { %292 = vmatpush.msrb.mxu1 %v277_v29 }
  0x90   :  { %358 = vtanh.f32 %v84_v31  ;;  %v275_v31 = vld [vmem:[#allocation5 + $0x2b8] sm:$0xff] }
  0x91   :  { %293 = vmatpush.msrb.mxu1 %v276_v30 }
  0x93   :  { %294 = vmatpush.msrb.mxu1 %v275_v31 }
  0x96   :  { %v359_v32 = vpop.eup %358 }
  0x97   :  { %122 = vmatmul.f32.vlgmr.msra.gmra.mxu1 %v359_v32  ;;  %v274_v32 = vld [vmem:[#allocation5 + $0x2b0] sm:$0xff] }
  0x98   :  { %295 = vmatpush.msrb.mxu1 %v274_v32 }
  0x9a   :  { %296 = vmatpush.msrb.mxu1 %v273_v33 }
 0x114   :  { %v123_v39 = vpop.f32.mrf.mxu1 }
 0x115   :  { %v124_v40 = vadd.f32 %v353_v38, %v123_v39  ;;  %v272_v38 = vld [vmem:[#allocation5 + $0x2a0] sm:$0xff]  ;;  %v271_v39 = vld [vmem:[#allocation5 + $0x298] sm:$0xff] }
 0x116   :  { %297 = vmatpush.msrb.mxu1 %v272_v38 }
 0x117   :  { %360 = vtanh.f32 %v124_v40  ;;  %v270_v40 = vld [vmem:[#allocation5 + $0x290] sm:$0xff] }
 0x118   :  { %298 = vmatpush.msrb.mxu1 %v271_v39 }
 0x11a   :  { %299 = vmatpush.msrb.mxu1 %v270_v40 }
 0x11d   :  { %v361_v41 = vpop.eup %360 }
 0x11e   :  { %162 = vmatmul.f32.vlgmr.msra.gmra.mxu2 %v361_v41  ;;  %v269_v41 = vld [vmem:[#allocation5 + $0x288] sm:$0xff] }
 0x11f   :  { %300 = vmatpush.msrb.mxu1 %v269_v41 }
 0x1a1   :  { %v163_v43 = vpop.f32.mrf.mxu2 }
 0x1a2   :  { %v164_v44 = vadd.f32 %v354_v42, %v163_v43  ;;  %v268_v42 = vld [vmem:[#allocation5 + $0x280] sm:$0xff] }
 0x1a3   :  { %301 = vmatpush.msrb.mxu1 %v268_v42  ;;  %v356_v43 = vld [vmem:[#allocation7 + $0x4] ss:$0 sm:$0xff] }
 0x1a4   :  { %v166_v45 = vmul.f32 1.442695, %v164_v44  ;;  %179 = vrot.lane.b32.xlu1 %v164_v44, %s477_s0 }
 0x1a6   :  { %362 = vpow2.f32 %v166_v45 }
 0x1ac   :  { %v363_v46 = vpop.eup %362 }
 0x1ad   :  { %v168_v47 = vmul.f32 %v363_v46, %v510_v1 }
 0x1af   :  { %170 = vrot.lane.b32.xlu0 %v168_v47, %s478_s2  ;;  %v357_v47 = vld [vmem:[#allocation7 + $0x5] ss:$0 sm:$0xff] }
 0x216   :  { %v520_v15 = vpop.permute.xlu1 %179 }
 0x221   :  { %v171_v63 = vpop.permute.xlu0 %170 }
 0x222   :  { %v173_v0 = vadd.f32 %v171_v63, %v164_v44 }
 0x224   :  { %175 = vrot.lane.b32.xlu0 %v173_v0, %s477_s0 }
 0x296   :  { %v518_v14 = vpop.permute.xlu0 %175 }
 0x297   :  { %v183_v16 = vsel %vm182_vm1, %v510_v1, %v518_v14 }
 0x298   :  { %v184_v17 = vsel %vm62_vm0, %v183_v16, %v520_v15 }
 0x299   :  { %343 = vmatmul.msk.f32.vlgmr.msra.gmra.mxu3 %vm185_vm2, %v184_v17 }
 0x31c   :  { %v223_v35 = vpop.f32.mrf.mxu3 }
 0x31d   :  { %v224_v36 = vadd.f32 %v355_v34, %v223_v35 }
 0x31f   :  { %364 = vtanh.f32 %v224_v36 }
 0x325   :  { %v365_v37 = vpop.eup %364 }
 0x326   :  { %262 = vmatmul.f32.vlgmr.msrb.gmra.mxu0 %v365_v37 }
 0x3a3   :  { %v263_v44 = vpop.f32.mrf.mxu0 }
 0x3a4   :  { %v264_v45 = vadd.f32 %v356_v43, %v263_v44 }
 0x3a6   :  { %366 = vtanh.f32 %v264_v45 }
 0x3ac   :  { %v367_v46 = vpop.eup %366 }
 0x3ad   :  { %302 = vmatmul.f32.vlgmr.msrb.gmra.mxu1 %v367_v46 }
 0x42a   :  { %v303_v48 = vpop.f32.mrf.mxu1 }
 0x42b   :  { %v304_v49 = vadd.f32 %v357_v47, %v303_v48 }
 0x42d   :  { %v306_v50 = vmul.f32 1.442695, %v304_v49  ;;  %315 = vrot.lane.b32.xlu2 %v304_v49, %s474_s21 }
 0x42f   :  { %368 = vpow2.f32 %v306_v50 }
 0x435   :  { %v369_v51 = vpop.eup %368 }
 0x436   :  { %309 = vrot.lane.b32.xlu1 %v369_v51, %s478_s2 }
 0x487   :  { %v316_v56 = vpop.permute.xlu2 %315 }
 0x4a8   :  { %v310_v52 = vpop.permute.xlu1 %309 }
 0x4a9   :  { %v312_v53 = vmul.f32 %v310_v52, %v510_v1 }
 0x4ab   :  { %v313_v54 = vadd.f32 %v312_v53, %v304_v49 }
 0x4ad   :  { %v318_v55 = vsel %vm182_vm1, %v313_v54, %v518_v14 }
 0x4ae   :  { %v319_v57 = vsel %vm62_vm0, %v318_v55, %v520_v15 }
 0x4af   :  { %v320_v58 = vsel %vm185_vm2, %v319_v57, %v316_v56 }
 0x4b0   :  { %v322_v1 = vsel %vm321_vm3, %v320_v58, 0.0 }
 0x4b1   :  { %323 = vst [vmem:[#allocation8] sm:$0xff] %v322_v1 }
 0x4b2   :  { %334 = dma.vmem_to_hbm [thread:$0]  %s330_s29, 128, %s332_s5, [#allocation4]  }
 0x4b3   :  { %470 = dma.done.wait [#allocation4], 128  }
 0x4b4   :  { %471 = vsyncadd [#allocation4], 4294967168 }
 0x4b5   :  { %339 = vsyncpa [#allocation3], 1 }
 0x4b6   :  { %340 = vsyncpa [#allocation6], 1 }
 0x4b7   :  { %341 = vsyncpa [#allocation4], 1 }

</bundles_post_ra>
